<compile_context>
chip_gen: v7x
topology: tpu7x:2x2x1
jax: 0.10.0
libtpu: 0.0.40
codegen_flags: <defaults>
</compile_context>

<pallas_src>
import jax
import jax.numpy as jnp
from jax import lax
from jax.experimental import pallas as pl
from jax.experimental.pallas import tpu as pltpu


def dqn_kernel(x_ref, w1_ref, b1_ref, w2_ref, b2_ref,
               w3_ref, b3_ref, w4_ref, b4_ref, o_ref):
    x = x_ref[...]                                             # (TB, 11)

    h = jnp.dot(x, w1_ref[...], preferred_element_type=jnp.float32) + b1_ref[...]
    h = lax.logistic(h)                                        # single EUP op

    h = jnp.dot(h, w2_ref[...], preferred_element_type=jnp.float32) + b2_ref[...]
    h = lax.logistic(h)

    h = jnp.dot(h, w3_ref[...], preferred_element_type=jnp.float32) + b3_ref[...]
    h = lax.logistic(h)                                        # (TB, 32)

    # Final layer has a single output unit: do it on the VPU (mul) + XLU
    # (lane reduce) instead of an N=1 MXU pass. w4_ref is (1, 32).
    out = jnp.sum(h * w4_ref[...], axis=-1, keepdims=True) + b4_ref[...]
    o_ref[...] = out.astype(o_ref.dtype)


def _round_up(n, m):
    return ((n + m - 1) // m) * m


def dqn_forward(x, params, *, block_b=256):
    """x: (B, 11) float32; params: weights (in,out) and biases (1,out)."""
    B, F = x.shape
    assert F == 11, F

    w1, b1 = params["w1"], params["b1"]
    w2, b2 = params["w2"], params["b2"]
    w3, b3 = params["w3"], params["b3"]
    w4, b4 = params["w4"], params["b4"]
    w4_row = w4.reshape(1, 32)          # (32,1) -> (1,32) for the VPU reduction

    # Batch tile: multiple of 8 sublanes; don't over-pad tiny batches.
    tb = min(block_b, _round_up(B, 8))
    b_pad = _round_up(B, tb)
    if b_pad != B:
        x = jnp.pad(x, ((0, b_pad - B), (0, 0)))

    def const_spec(shape):
        # Full-extent block, resident across all grid steps.
        return pl.BlockSpec(shape, lambda i: tuple(0 for _ in shape))

    out = pl.pallas_call(
        dqn_kernel,
        out_shape=jax.ShapeDtypeStruct((b_pad, 1), jnp.float32),
        grid=(b_pad // tb,),
        in_specs=[
            pl.BlockSpec((tb, 11), lambda i: (i, 0)),          # x: batch-tiled
            const_spec(w1.shape), const_spec(b1.shape),
            const_spec(w2.shape), const_spec(b2.shape),
            const_spec(w3.shape), const_spec(b3.shape),
            const_spec(w4_row.shape), const_spec(b4.shape),
        ],
        out_specs=pl.BlockSpec((tb, 1), lambda i: (i, 0)),
        compiler_params=pltpu.CompilerParams(
            dimension_semantics=("parallel",),                 # megacore on v7x
            vmem_limit_bytes=32 * 1024 * 1024,                 # safe on v5e/v6e/v7x
        ),
    )(x, w1, b1, w2, b2, w3, b3, w4_row, b4)

    return out[:B]


def init_params(key):
    """Deterministic init mimicking PyTorch nn.Linear default:
    U(-1/sqrt(fan_in), 1/sqrt(fan_in)) for weights and biases."""
    dims = [(11, 128), (128, 64), (64, 32), (32, 1)]
    params = {}
    keys = jax.random.split(key, 2 * len(dims))
    for idx, (fan_in, fan_out) in enumerate(dims):
        bound = 1.0 / jnp.sqrt(jnp.float32(fan_in))
        w = jax.random.uniform(keys[2 * idx], (fan_in, fan_out),
                               dtype=jnp.float32, minval=-bound, maxval=bound)
        b = jax.random.uniform(keys[2 * idx + 1], (1, fan_out),
                               dtype=jnp.float32, minval=-bound, maxval=bound)
        params[f"w{idx + 1}"] = w
        params[f"b{idx + 1}"] = b
    return params


def reference_forward(x, params):
    h = x
    for i in range(1, 4):
        h = jax.nn.sigmoid(h @ params[f"w{i}"] + params[f"b{i}"])
    return h @ params["w4"] + params["b4"]


if __name__ == "__main__":
    key = jax.random.PRNGKey(0)
    k_params, k_x1, k_x2 = jax.random.split(key, 3)

    params = init_params(k_params)

    # Small single-tile case (matches original module usage).
    B1 = 8
    x1 = jax.random.normal(k_x1, (B1, 11), dtype=jnp.float32)
    out1 = jax.block_until_ready(dqn_forward(x1, params))
    ref1 = reference_forward(x1, params)
    assert out1.shape == (B1, 1), out1.shape
    assert jnp.allclose(out1, ref1, atol=1e-5, rtol=1e-5), (
        f"max abs err {jnp.max(jnp.abs(out1 - ref1))}")

    # Multi-tile case with a ragged tail (exercises batch tiling + padding).
    B2 = 300
    x2 = jax.random.normal(k_x2, (B2, 11), dtype=jnp.float32)
    out2 = jax.block_until_ready(dqn_forward(x2, params))
    ref2 = reference_forward(x2, params)
    assert out2.shape == (B2, 1), out2.shape
    assert jnp.allclose(out2, ref2, atol=1e-5, rtol=1e-5), (
        f"max abs err {jnp.max(jnp.abs(out2 - ref2))}")

    print("KERNEL_OK")
</pallas_src>

<mosaic_0001>
module attributes {stable_mosaic.version = 11 : i64} {
  func.func @dqn_kernel(%arg0: i32, %arg1: memref<8x11xf32, #tpu.memory_space<vmem>>, %arg2: memref<11x128xf32, #tpu.memory_space<vmem>>, %arg3: memref<1x128xf32, #tpu.memory_space<vmem>>, %arg4: memref<128x64xf32, #tpu.memory_space<vmem>>, %arg5: memref<1x64xf32, #tpu.memory_space<vmem>>, %arg6: memref<64x32xf32, #tpu.memory_space<vmem>>, %arg7: memref<1x32xf32, #tpu.memory_space<vmem>>, %arg8: memref<1x32xf32, #tpu.memory_space<vmem>>, %arg9: memref<1x1xf32, #tpu.memory_space<vmem>>, %arg10: memref<8x1xf32, #tpu.memory_space<vmem>>) attributes {dimension_semantics = [#tpu.dimension_semantics<parallel>], iteration_bounds = array<i64: 1>, scalar_prefetch = 0 : i64, scratch_operands = 0 : i64, tpu.core_type = #tpu.core_type<tc>, window_params = [{transform_indices = @transform_0, window_bounds = array<i64: 8, 11>}, {pipeline_mode = #tpu.pipeline_mode<synchronous>, transform_indices = @transform_1, window_bounds = array<i64: 11, 128>}, {pipeline_mode = #tpu.pipeline_mode<synchronous>, transform_indices = @transform_2, window_bounds = array<i64: 1, 128>}, {pipeline_mode = #tpu.pipeline_mode<synchronous>, transform_indices = @transform_3, window_bounds = array<i64: 128, 64>}, {pipeline_mode = #tpu.pipeline_mode<synchronous>, transform_indices = @transform_4, window_bounds = array<i64: 1, 64>}, {pipeline_mode = #tpu.pipeline_mode<synchronous>, transform_indices = @transform_5, window_bounds = array<i64: 64, 32>}, {pipeline_mode = #tpu.pipeline_mode<synchronous>, transform_indices = @transform_6, window_bounds = array<i64: 1, 32>}, {pipeline_mode = #tpu.pipeline_mode<synchronous>, transform_indices = @transform_7, window_bounds = array<i64: 1, 32>}, {pipeline_mode = #tpu.pipeline_mode<synchronous>, transform_indices = @transform_8, window_bounds = array<i64: 1, 1>}, {transform_indices = @transform_9, window_bounds = array<i64: 8, 1>}]} {
    %c0 = arith.constant 0 : index
    %c0_0 = arith.constant 0 : index
    %0 = vector.load %arg1[%c0, %c0_0] : memref<8x11xf32, #tpu.memory_space<vmem>>, vector<8x11xf32>
    %c0_1 = arith.constant 0 : index
    %c0_2 = arith.constant 0 : index
    %1 = vector.load %arg2[%c0_1, %c0_2] : memref<11x128xf32, #tpu.memory_space<vmem>>, vector<11x128xf32>
    %cst = arith.constant dense<0.000000e+00> : vector<8x128xf32>
    %2 = tpu.matmul %0, %1, %cst {dimension_numbers = #tpu.dot_dimension_numbers<[1], [0], [0], [1], [0, 0, 1, 1], [], []>} : vector<8x11xf32>, vector<11x128xf32>, vector<8x128xf32> -> vector<8x128xf32>
    %c0_3 = arith.constant 0 : index
    %c0_4 = arith.constant 0 : index
    %3 = vector.load %arg3[%c0_3, %c0_4] : memref<1x128xf32, #tpu.memory_space<vmem>>, vector<1x128xf32>
    %4 = vector.broadcast %3 : vector<1x128xf32> to vector<8x128xf32>
    %5 = arith.addf %2, %4 : vector<8x128xf32>
    %6 = arith.negf %5 : vector<8x128xf32>
    %7 = math.exp %6 : vector<8x128xf32>
    %cst_5 = arith.constant 1.000000e+00 : f32
    %8 = vector.broadcast %cst_5 : f32 to vector<8x128xf32>
    %9 = arith.addf %8, %7 : vector<8x128xf32>
    %10 = arith.divf %8, %9 : vector<8x128xf32>
    %c0_6 = arith.constant 0 : index
    %c0_7 = arith.constant 0 : index
    %11 = vector.load %arg4[%c0_6, %c0_7] : memref<128x64xf32, #tpu.memory_space<vmem>>, vector<128x64xf32>
    %cst_8 = arith.constant dense<0.000000e+00> : vector<8x64xf32>
    %12 = tpu.matmul %10, %11, %cst_8 {dimension_numbers = #tpu.dot_dimension_numbers<[1], [0], [0], [1], [0, 0, 1, 1], [], []>} : vector<8x128xf32>, vector<128x64xf32>, vector<8x64xf32> -> vector<8x64xf32>
    %c0_9 = arith.constant 0 : index
    %c0_10 = arith.constant 0 : index
    %13 = vector.load %arg5[%c0_9, %c0_10] : memref<1x64xf32, #tpu.memory_space<vmem>>, vector<1x64xf32>
    %14 = vector.broadcast %13 : vector<1x64xf32> to vector<8x64xf32>
    %15 = arith.addf %12, %14 : vector<8x64xf32>
    %16 = arith.negf %15 : vector<8x64xf32>
    %17 = math.exp %16 : vector<8x64xf32>
    %cst_11 = arith.constant 1.000000e+00 : f32
    %18 = vector.broadcast %cst_11 : f32 to vector<8x64xf32>
    %19 = arith.addf %18, %17 : vector<8x64xf32>
    %20 = arith.divf %18, %19 : vector<8x64xf32>
    %c0_12 = arith.constant 0 : index
    %c0_13 = arith.constant 0 : index
    %21 = vector.load %arg6[%c0_12, %c0_13] : memref<64x32xf32, #tpu.memory_space<vmem>>, vector<64x32xf32>
    %cst_14 = arith.constant dense<0.000000e+00> : vector<8x32xf32>
    %22 = tpu.matmul %20, %21, %cst_14 {dimension_numbers = #tpu.dot_dimension_numbers<[1], [0], [0], [1], [0, 0, 1, 1], [], []>} : vector<8x64xf32>, vector<64x32xf32>, vector<8x32xf32> -> vector<8x32xf32>
    %c0_15 = arith.constant 0 : index
    %c0_16 = arith.constant 0 : index
    %23 = vector.load %arg7[%c0_15, %c0_16] : memref<1x32xf32, #tpu.memory_space<vmem>>, vector<1x32xf32>
    %24 = vector.broadcast %23 : vector<1x32xf32> to vector<8x32xf32>
    %25 = arith.addf %22, %24 : vector<8x32xf32>
    %26 = arith.negf %25 : vector<8x32xf32>
    %27 = math.exp %26 : vector<8x32xf32>
    %cst_17 = arith.constant 1.000000e+00 : f32
    %28 = vector.broadcast %cst_17 : f32 to vector<8x32xf32>
    %29 = arith.addf %28, %27 : vector<8x32xf32>
    %30 = arith.divf %28, %29 : vector<8x32xf32>
    %c0_18 = arith.constant 0 : index
    %c0_19 = arith.constant 0 : index
    %31 = vector.load %arg8[%c0_18, %c0_19] : memref<1x32xf32, #tpu.memory_space<vmem>>, vector<1x32xf32>
    %32 = vector.broadcast %31 : vector<1x32xf32> to vector<8x32xf32>
    %33 = arith.mulf %30, %32 : vector<8x32xf32>
    %cst_20 = arith.constant dense<0.000000e+00> : vector<8xf32>
    %34 = vector.multi_reduction <add>, %33, %cst_20 [1] : vector<8x32xf32> to vector<8xf32>
    %35 = vector.shape_cast %34 : vector<8xf32> to vector<8x1xf32>
    %c0_21 = arith.constant 0 : index
    %c0_22 = arith.constant 0 : index
    %36 = vector.load %arg9[%c0_21, %c0_22] : memref<1x1xf32, #tpu.memory_space<vmem>>, vector<1x1xf32>
    %37 = vector.broadcast %36 : vector<1x1xf32> to vector<8x1xf32>
    %38 = arith.addf %35, %37 : vector<8x1xf32>
    %c0_23 = arith.constant 0 : index
    %c0_24 = arith.constant 0 : index
    %39 = vector.load %arg10[%c0_23, %c0_24] : memref<8x1xf32, #tpu.memory_space<vmem>>, vector<8x1xf32>
    tpu.vector_store %arg10[%c0_23, %c0_24], %38 {strides = array<i32>} : memref<8x1xf32, #tpu.memory_space<vmem>>, vector<8x1xf32>,
    return
  }
  func.func @transform_0(%arg0: i32) -> (i32, i32) {
    %c0_i32 = arith.constant 0 : i32
    %c0_i32_0 = arith.constant 0 : i32
    return %arg0, %c0_i32 : i32, i32
  }
  func.func @transform_1(%arg0: i32) -> (i32, i32) {
    %c0_i32 = arith.constant 0 : i32
    %c0_i32_0 = arith.constant 0 : i32
    %c0_i32_1 = arith.constant 0 : i32
    return %c0_i32, %c0_i32_0 : i32, i32
  }
  func.func @transform_2(%arg0: i32) -> (i32, i32) {
    %c0_i32 = arith.constant 0 : i32
    %c0_i32_0 = arith.constant 0 : i32
    %c0_i32_1 = arith.constant 0 : i32
    return %c0_i32, %c0_i32_0 : i32, i32
  }
  func.func @transform_3(%arg0: i32) -> (i32, i32) {
    %c0_i32 = arith.constant 0 : i32
    %c0_i32_0 = arith.constant 0 : i32
    %c0_i32_1 = arith.constant 0 : i32
    return %c0_i32, %c0_i32_0 : i32, i32
  }
  func.func @transform_4(%arg0: i32) -> (i32, i32) {
    %c0_i32 = arith.constant 0 : i32
    %c0_i32_0 = arith.constant 0 : i32
    %c0_i32_1 = arith.constant 0 : i32
    return %c0_i32, %c0_i32_0 : i32, i32
  }
  func.func @transform_5(%arg0: i32) -> (i32, i32) {
    %c0_i32 = arith.constant 0 : i32
    %c0_i32_0 = arith.constant 0 : i32
    %c0_i32_1 = arith.constant 0 : i32
    return %c0_i32, %c0_i32_0 : i32, i32
  }
  func.func @transform_6(%arg0: i32) -> (i32, i32) {
    %c0_i32 = arith.constant 0 : i32
    %c0_i32_0 = arith.constant 0 : i32
    %c0_i32_1 = arith.constant 0 : i32
    return %c0_i32, %c0_i32_0 : i32, i32
  }
  func.func @transform_7(%arg0: i32) -> (i32, i32) {
    %c0_i32 = arith.constant 0 : i32
    %c0_i32_0 = arith.constant 0 : i32
    %c0_i32_1 = arith.constant 0 : i32
    return %c0_i32, %c0_i32_0 : i32, i32
  }
  func.func @transform_8(%arg0: i32) -> (i32, i32) {
    %c0_i32 = arith.constant 0 : i32
    %c0_i32_0 = arith.constant 0 : i32
    %c0_i32_1 = arith.constant 0 : i32
    return %c0_i32, %c0_i32_0 : i32, i32
  }
  func.func @transform_9(%arg0: i32) -> (i32, i32) {
    %c0_i32 = arith.constant 0 : i32
    %c0_i32_0 = arith.constant 0 : i32
    return %arg0, %c0_i32 : i32, i32
  }
}

</mosaic_0001>

<bundles_post_ra>
// kernel: tpu_custom_call.1
= control target key start
LH: loop header
LB: loop body
LE: loop exit
PB: predicated region body
PF: predicated region fallthrough
CT: control target
= control target key end

     0   :  { %vm48_vm0 = vcmask 1042432   ;;  %v505_v0 = vmov 0.0|0.0   ;;  %vm506_vm1 = vmmov 1   ;;  %vm507_vm3 = vmmov 0   ;;  %s671_s1 = inlined_call_operand.vmem [shape: f32[11,128], index: 1, kind: input, shape index: {}]   ;;  %s672_s3 = inlined_call_operand.vmem [shape: f32[128,64], index: 3, kind: input, shape index: {}]   ;;  %s673_s0 = inlined_call_operand.vmem [shape: f32[8,11], index: 0, kind: input, shape index: {}]   ;;  %s674_s2 = inlined_call_operand.vmem [shape: f32[1,128], index: 2, kind: input, shape index: {}]   ;;  %s675_s5 = inlined_call_operand.vmem [shape: f32[64,32], index: 5, kind: input, shape index: {}]   ;;  %s676_s4 = inlined_call_operand.vmem [shape: f32[1,64], index: 4, kind: input, shape index: {}]   ;;  %s677_s8 = inlined_call_operand.<no memory space> [shape: f32[1,1], index: 8, kind: input, shape index: {}]   ;;  %s678_s6 = inlined_call_operand.vmem [shape: f32[1,32], index: 6, kind: input, shape index: {}]   ;;  %s679_s7 = inlined_call_operand.vmem [shape: f32[1,32], index: 7, kind: input, shape index: {}]   ;;  %s680_s9 = inlined_call_operand.vmem [shape: f32[8,1], index: 9, kind: output, shape index: {}]  }
   0x1   :  { %449 = vmatprep.subr.bf16.mxu0 %v505_v0  ;;  %v35_v1 = vld [vmem:[%s671_s1] sm:$0xff]  ;;  %v36_v2 = vld [vmem:[%s671_s1 + $0x8] sm:$0x7]  ;;  %vm451_vm2 = vmpackc.low %vm48_vm0, %vm506_vm1  ;;  %453 = vmatprep.subr.bf16.mxu1 %v505_v0  ;;  %v508_v4 = vmov 0.0   ;;  %vm44_vm4 = vcmask 89088   ;;  %vm242_vm5 = vcmask 523264   ;;  %v14_v58 = vstv %s677_s8 }
   0x2   :  { %v450_v3 = vpack.c.bf16 %v36_v2, %v35_v1  ;;  %392 = vmatprep.mubr.msk.f32.mxu0 %vm507_vm3, %v508_v4  ;;  %v128_v5 = vld [vmem:[%s672_s3] sm:$0xff]  ;;  %v129_v6 = vld [vmem:[%s672_s3 + $0x8] sm:$0xff]  ;;  %427 = vmatprep.mubr.msk.f32.mxu1 %vm507_vm3, %v508_v4  ;;  %v130_v9 = vld [vmem:[%s672_s3 + $0x10] sm:$0xff]  ;;  %15 = vst [vmem:[#allocation2] sm:$0x1] %v14_v58  ;;  %vm330_vm6 = vcmask 261120  }
   0x3   :  { %v454_v7 = vpack.c.bf16 %v129_v6, %v128_v5  ;;  %v34_v8 = vld [vmem:[%s673_s0] sm:$0xff]  ;;  %v131_v10 = vld [vmem:[%s672_s3 + $0x18] sm:$0xff]  ;;  %v133_v13 = vld [vmem:[%s672_s3 + $0x28] sm:$0xff]  ;;  %vm342_vm7 = vcmask 7168  }
   0x4   :  { %452 = vmatpush3.bf16.msk.msra.mxu0 %vm451_vm2, %v450_v3  ;;  %v457_v11 = vpack.c.bf16 %v131_v10, %v130_v9  ;;  %v132_v12 = vld [vmem:[%s672_s3 + $0x20] sm:$0xff]  ;;  %v134_v15 = vld [vmem:[%s672_s3 + $0x30] sm:$0xff]  ;;  %v135_v16 = vld [vmem:[%s672_s3 + $0x38] sm:$0xff] }
   0x5   :  { %455 = vmatpush3.bf16.msra.mxu1 %v454_v7  ;;  %477 = vmatprep.subr.bf16.mxu0 %v505_v0  ;;  %v460_v14 = vpack.c.bf16 %v133_v13, %v132_v12  ;;  %v463_v17 = vpack.c.bf16 %v135_v16, %v134_v15  ;;  %v136_v18 = vld [vmem:[%s672_s3 + $0x40] sm:$0xff]  ;;  %v137_v19 = vld [vmem:[%s672_s3 + $0x48] sm:$0xff]  ;;  %v138_v21 = vld [vmem:[%s672_s3 + $0x50] sm:$0xff] }
   0x6   :  { %456 = vmatprep.subr.bf16.mxu1 %v505_v0  ;;  %v466_v20 = vpack.c.bf16 %v137_v19, %v136_v18  ;;  %v139_v22 = vld [vmem:[%s672_s3 + $0x58] sm:$0xff]  ;;  %v140_v24 = vld [vmem:[%s672_s3 + $0x60] sm:$0xff]  ;;  %v141_v25 = vld [vmem:[%s672_s3 + $0x68] sm:$0xff] }
   0x7   :  { %393 = vmatmul.mubr.msk.f32.vlgmr.msra.gmra.mrb[0].mxu0 %vm44_vm4, %v34_v8  ;;  %v469_v23 = vpack.c.bf16 %v139_v22, %v138_v21  ;;  %v472_v26 = vpack.c.bf16 %v141_v25, %v140_v24  ;;  %v142_v27 = vld [vmem:[%s672_s3 + $0x70] sm:$0xff]  ;;  %v143_v28 = vld [vmem:[%s672_s3 + $0x78] sm:$0xff]  ;;  %v348_v30 = vld [vmem:[%s674_s2] ss:$0 sm:$0xff] }
   0x8   :  { %446 = vmatprep.mubr.msk.f32.mxu0 %vm507_vm3, %v508_v4  ;;  %v475_v29 = vpack.c.bf16 %v143_v28, %v142_v27  ;;  %v227_v38 = vld [vmem:[%s675_s5] sm:$0xff]  ;;  %v228_v39 = vld [vmem:[%s675_s5 + $0x8] sm:$0xff]  ;;  %v229_v41 = vld [vmem:[%s675_s5 + $0x10] sm:$0xff] }
   0x9   :  { %458 = vmatpush3.bf16.msra.mxu1 %v457_v11  ;;  %v478_v40 = vpack.c.bf16 %v228_v39, %v227_v38  ;;  %v230_v42 = vld [vmem:[%s675_s5 + $0x18] sm:$0xff]  ;;  %v231_v44 = vld [vmem:[%s675_s5 + $0x20] sm:$0xff]  ;;  %v232_v45 = vld [vmem:[%s675_s5 + $0x28] sm:$0xff] }
   0xa   :  { %459 = vmatprep.subr.bf16.mxu1 %v505_v0  ;;  %v481_v43 = vpack.c.bf16 %v230_v42, %v229_v41  ;;  %v484_v46 = vpack.c.bf16 %v232_v45, %v231_v44  ;;  %v233_v47 = vld [vmem:[%s675_s5 + $0x30] sm:$0xff]  ;;  %v234_v48 = vld [vmem:[%s675_s5 + $0x38] sm:$0xff]  ;;  %v352_v50 = vld [vmem:[%s676_s4] ss:$0 sm:$0xff] }
   0xb   :  { %479 = vmatpush3.bf16.msra.mxu0 %v478_v40  ;;  %v487_v49 = vpack.c.bf16 %v234_v48, %v233_v47  ;;  %v354_v59 = vld [vmem:[%s678_s6] ss:$0 sm:$0xff] }
   0xc   :  { %480 = vmatprep.subr.bf16.mxu0 %v505_v0  ;;  %v357_v2 = vld [vmem:[%s679_s7] ss:$0 sm:$0xff] }
   0xd   :  { %461 = vmatpush3.bf16.msra.mxu1 %v460_v14  ;;  %v358_v6 = vld [vmem:[#allocation2] ss:$0 sm:$0xff] }
   0xe   :  { %462 = vmatprep.subr.bf16.mxu1 %v505_v0 }
   0xf   :  { %482 = vmatpush3.bf16.msra.mxu0 %v481_v43 }
  0x10   :  { %483 = vmatprep.subr.bf16.mxu0 %v505_v0 }
  0x11   :  { %464 = vmatpush3.bf16.msra.mxu1 %v463_v17 }
  0x12   :  { %465 = vmatprep.subr.bf16.mxu1 %v505_v0 }
  0x13   :  { %485 = vmatpush3.bf16.msra.mxu0 %v484_v46 }
  0x14   :  { %486 = vmatprep.subr.bf16.mxu0 %v505_v0 }
  0x15   :  { %467 = vmatpush3.bf16.msra.mxu1 %v466_v20 }
  0x16   :  { %468 = vmatprep.subr.bf16.mxu1 %v505_v0 }
  0x17   :  { %488 = vmatpush3.bf16.msra.mxu0 %v487_v49 }
  0x19   :  { %470 = vmatpush3.bf16.msra.mxu1 %v469_v23 }
  0x1a   :  { %471 = vmatprep.subr.bf16.mxu1 %v505_v0 }
  0x1d   :  { %473 = vmatpush3.bf16.msra.mxu1 %v472_v26 }
  0x1e   :  { %474 = vmatprep.subr.bf16.mxu1 %v505_v0 }
  0x21   :  { %476 = vmatpush3.bf16.msra.mxu1 %v475_v29 }
  0xda   :  { %v118_v31 = vpop.f32.mrb[0].mxu0 }
  0xdb   :  { %v119_v32 = vadd.f32 %v348_v30, %v118_v31  ;;  %v394_v33 = vpop.f32.mrb[1].mxu0 }
  0xdd   :  { %v351_v34 = vmul.f32 -1.442695, %v119_v32 }
  0xdf   :  { %493 = vpow2.f32 %v351_v34 }
  0xe9   :  { %v494_v35 = vpop.eup %493 }
  0xea   :  { %v125_v36 = vadd.f32 1.0, %v494_v35 }
  0xec   :  { %495 = vrcp.f32 %v125_v36 }
  0xf6   :  { %v496_v37 = vpop.eup %495 }
  0xf7   :  { %428 = vmatmul.mubr.f32.vlgmr.msra.gmra.mrb[0].mxu1 %v496_v37 }
 0x1ca   :  { %v217_v51 = vpop.f32.mrb[0].mxu1 }
 0x1cb   :  { %v218_v52 = vadd.f32 %v352_v50, %v217_v51  ;;  %v429_v53 = vpop.f32.mrb[1].mxu1 }
 0x1cd   :  { %v353_v54 = vmul.f32 -1.442695, %v218_v52 }
 0x1cf   :  { %497 = vpow2.f32 %v353_v54 }
 0x1d9   :  { %v498_v55 = vpop.eup %497 }
 0x1da   :  { %v224_v56 = vadd.f32 1.0, %v498_v55 }
 0x1dc   :  { %499 = vrcp.f32 %v224_v56 }
 0x1e6   :  { %v500_v57 = vpop.eup %499 }
 0x1e7   :  { %447 = vmatmul.mubr.msk.f32.vlgmr.msra.gmra.mrb[2].mxu0 %vm242_vm5, %v500_v57 }
 0x2ba   :  { %v312_v60 = vpop.f32.mrb[2].mxu0 }
 0x2bb   :  { %v313_v61 = vadd.f32 %v354_v59, %v312_v60  ;;  %v448_v62 = vpop.f32.mrb[3].mxu0 }
 0x2bd   :  { %v356_v63 = vmul.f32 -1.442695, %v313_v61 }
 0x2bf   :  { %501 = vpow2.f32 %v356_v63 }
 0x2c9   :  { %v502_v0 = vpop.eup %501 }
 0x2ca   :  { %v319_v1 = vadd.f32 1.0, %v502_v0 }
 0x2cc   :  { %503 = vrcp.f32 %v319_v1 }
 0x2d6   :  { %v504_v3 = vpop.eup %503 }
 0x2d7   :  { %v329_v4 = vmul.f32 %v504_v3, %v357_v2 }
 0x2d9   :  { %v331_v5 = vsel %vm330_vm6, %v329_v4, 0.0 }
 0x2da   :  { %332 = vadd.xlane.f32.xlu0 %v331_v5 }
 0x367   :  { %v333_v7 = vpop.xlane.xlu0 %332 }
 0x368   :  { %v341_v8 = vadd.f32 %v358_v6, %v333_v7 }
 0x36a   :  { %343 = vst.msk [vmem:[%s680_s9] sm:$0xff] %vm342_vm7, %v341_v8 }

</bundles_post_ra>
